<compile_context>
chip_gen: v6e
topology: v6e:2x2x1
jax: 0.10.0
libtpu: 0.0.40
codegen_flags: <defaults>
</compile_context>

<pallas_src>
import functools
import math

import numpy as np
import jax
import jax.numpy as jnp
from jax import lax
from jax.experimental import pallas as pl
from jax.experimental.pallas import tpu as pltpu


def _round_up(x, m):
    return ((x + m - 1) // m) * m


def _cdiv(a, b):
    return (a + b - 1) // b


# ----------------------------------------------------------------------------
# Glue: sample_embedding (F.affine_grid + F.grid_sample with identity theta ==
# separable linear down-sampling; reflection padding never triggers because all
# sample positions fall inside the input).
# TODO(synk): generic grid_sample (arbitrary theta / reflection) has no clean
# Pallas equivalent; the identity-affine case used by this module is done in JAX.
# ----------------------------------------------------------------------------
def _axis_positions(s_in, s_out):
    i = jnp.arange(s_out, dtype=jnp.float32)
    pos = (i + 0.5) * (float(s_in) / float(s_out)) - 0.5
    pos = jnp.clip(pos, 0.0, float(s_in) - 1.0)
    i0 = jnp.clip(jnp.floor(pos).astype(jnp.int32), 0, s_in - 1)
    i1 = jnp.clip(i0 + 1, 0, s_in - 1)
    w = pos - i0.astype(jnp.float32)
    return i0, i1, w


def _interp_axis(x, axis, i0, i1, w):
    x0 = jnp.take(x, i0, axis=axis)
    x1 = jnp.take(x, i1, axis=axis)
    shape = [1] * x.ndim
    shape[axis] = -1
    w = w.reshape(shape)
    return x0 * (1.0 - w) + x1 * w


def sample_embedding(emb, coord, reduction_factor, jitter=None):
    """emb, coord: (B, C, H, W, D).

    Returns emb_T (B, C, hwd) (channel-major -> points stay lane-dense) and
    coord (B, 3, h, w, d)."""
    B, C = emb.shape[0], emb.shape[1]
    reduced = [max(int(s // reduction_factor), 1) for s in emb.shape[2:]]
    if jitter is not None:
        j = jitter
        emb = emb[:, :, j[0]:emb.shape[2] - j[1], j[2]:emb.shape[3] - j[3],
                  j[4]:emb.shape[4] - j[5]]
        coord = coord[:, :, j[0]:coord.shape[2] - j[1], j[2]:coord.shape[3] - j[3],
                      j[4]:coord.shape[4] - j[5]]
    e, c = emb, coord
    for ax in range(3):
        i0, i1, w = _axis_positions(e.shape[2 + ax], reduced[ax])
        e = _interp_axis(e, 2 + ax, i0, i1, w)
        c = _interp_axis(c, 2 + ax, i0, i1, w)
    return e.reshape(B, C, -1), c


# ----------------------------------------------------------------------------
# Pallas kernel 1: fused soft-k-means clustering (all iterations in one call),
# (P, N)-oriented working set, lane-dense X^T input, bf16 MXU operands.
# ----------------------------------------------------------------------------
def _cluster_kernel(n_iter, C, temp, inv_two_sigma2,
                    x_ref, emb_p0_ref, coord_p0_ref,
                    sim_ref, emb_pn_out_ref):
    XT = x_ref[0]                               # (C+4, N), N lane-dense
    emb_tT = XT[:C, :]                          # (C, N)
    ctT = XT[C:C + 3, :]                        # (3, N)

    # L2-normalize teacher embeddings once (channel axis = sublanes).
    # rsqrt(max(ss, 1e-24)) == 1 / max(||x||, 1e-12)  (matches F.normalize eps)
    t_sumsq = jnp.sum(emb_tT * emb_tT, axis=0, keepdims=True)         # (1, N)
    emb_tnT = emb_tT * lax.rsqrt(jnp.maximum(t_sumsq, 1e-24))         # (C, N)
    emb_tnT_bf = emb_tnT.astype(jnp.bfloat16)
    XT_bf = XT.astype(jnp.bfloat16)
    ct_sqT = jnp.sum(ctT * ctT, axis=0, keepdims=True)                # (1, N)
    inv_temp = float(1.0 / temp)

    def normalize_p(emb_p):
        p_sumsq = jnp.sum(emb_p * emb_p, axis=1, keepdims=True)       # (P, 1)
        return emb_p * lax.rsqrt(jnp.maximum(p_sumsq, 1e-24))

    def weighted_sim(emb_pn, cp):
        # emb_pn: (P, C) L2-normalized prototypes, cp: (P, 3)
        logits = lax.dot_general(emb_pn.astype(jnp.bfloat16), emb_tnT_bf,
                                 (((1,), (0,)), ((), ())),
                                 preferred_element_type=jnp.float32) * inv_temp   # (P, N)
        logits = logits - jnp.max(logits, axis=0, keepdims=True)
        ex = jnp.exp(logits)
        sim_soft = ex * pl.reciprocal(jnp.sum(ex, axis=0, keepdims=True),
                                      approx=True)                    # (P, N)
        # gaussian positional weights: ||cp-ct||^2 = ||cp||^2 + ||ct||^2 - 2 cp.ct
        cp_sq = jnp.sum(cp * cp, axis=1, keepdims=True)               # (P, 1)
        cross = lax.dot_general(cp, ctT, (((1,), (0,)), ((), ())),
                                preferred_element_type=jnp.float32)   # (P, N)
        dist2 = jnp.maximum(cp_sq + ct_sqT - 2.0 * cross, 0.0)
        return sim_soft * jnp.exp(-dist2 * inv_two_sigma2)            # (P, N)

    def body(_, carry):
        emb_p, cp = carry
        sim_w = weighted_sim(normalize_p(emb_p), cp)                   # (P, N)
        # fused weighted means: one MXU pass over [emb_t | coord_t | 1]^T
        agg = lax.dot_general(sim_w.astype(jnp.bfloat16), XT_bf,
                              (((1,), (1,)), ((), ())),
                              preferred_element_type=jnp.float32)      # (P, C+4)
        # tiny (P,1) divide kept exact (guarded against empty clusters)
        inv_den = 1.0 / jnp.maximum(agg[:, C + 3:C + 4], 1e-12)
        return agg[:, :C] * inv_den, agg[:, C:C + 3] * inv_den

    emb_p, cp = lax.fori_loop(0, n_iter, body,
                              (emb_p0_ref[0], coord_p0_ref[0]))

    emb_pn = normalize_p(emb_p)
    # final sim_t_p with the final prototypes, written to HBM once, lane-dense
    sim_ref[0] = weighted_sim(emb_pn, cp)                              # (P, N)
    emb_pn_out_ref[0] = emb_pn                                         # (P, C)


def _cluster_vmem_bytes(N, C, P):
    npad = _round_up(N, 128)
    rx = _round_up(C + 4, 8)
    rc = _round_up(C, 8)
    rp = _round_up(max(P, 1), 8)
    io = 2 * (rx + rp) * npad * 4                      # double-buffered X in + sim out
    tmp = (3 * rc + 2 * rx + 10 * rp + 8 * 8) * npad * 4   # f32/bf16 copies + (P,N)/(1,N) temps
    return io + tmp


def cluster_prototypes(x, emb_p0, coord_p0, n_iter, temp, sigma2):
    """x: (B, C+4, N) lane-dense [emb_t | coord_t | 1]^T.
    Returns sim_t_p (B, P, N) and L2-normalized prototypes emb_pn (B, P, C)."""
    B, Cp4, N = x.shape
    C = Cp4 - 4
    P = emb_p0.shape[1]
    kernel = functools.partial(_cluster_kernel, int(n_iter), int(C),
                               float(temp), float(1.0 / (2.0 * sigma2)))
    # shape-derived VMEM budget, capped safely below v7x's 64 MiB physical VMEM
    # TODO(synk): workloads whose per-batch working set exceeds this cap need an
    # extra N-tiling pass inside the clustering kernel.
    vmem_limit = int(min(60 * 2 ** 20,
                         max(8 * 2 ** 20, 2 * _cluster_vmem_bytes(N, C, P))))
    return pl.pallas_call(
        kernel,
        out_shape=(jax.ShapeDtypeStruct((B, P, N), jnp.float32),
                   jax.ShapeDtypeStruct((B, P, C), jnp.float32)),
        grid=(B,),
        in_specs=[pl.BlockSpec((1, Cp4, N), lambda b: (b, 0, 0)),
                  pl.BlockSpec((1, P, C), lambda b: (b, 0, 0)),
                  pl.BlockSpec((1, P, 3), lambda b: (b, 0, 0))],
        out_specs=(pl.BlockSpec((1, P, N), lambda b: (b, 0, 0)),
                   pl.BlockSpec((1, P, C), lambda b: (b, 0, 0))),
        compiler_params=pltpu.CompilerParams(
            dimension_semantics=("parallel",),        # B feeds both v7x TCs
            vmem_limit_bytes=vmem_limit),
    )(x, emb_p0, coord_p0)


# ----------------------------------------------------------------------------
# Pallas kernel 2: nearest teacher point per student point, streamed over N.
# Distance tile (tn, M): student points lane-dense; running min/argmin
# accumulators (1, M) lane-dense; idx emitted as int32.
# ----------------------------------------------------------------------------
def _nearest_kernel(max_dist2, N, tn, czT_ref, ct_ref, idx_ref, mask_ref,
                    dmin_ref, arg_ref):
    nt = pl.program_id(1)

    @pl.when(nt == 0)
    def _():
        dmin_ref[...] = jnp.full(dmin_ref.shape, jnp.inf, jnp.float32)
        arg_ref[...] = jnp.zeros(arg_ref.shape, jnp.float32)

    czT = czT_ref[0]                            # (3, M), M lane-dense
    ct = ct_ref[0]                              # (tn, 3)
    M = czT.shape[1]

    # exact per-axis differences (keeps torch argmin tie behaviour)
    d2 = jnp.zeros((tn, M), jnp.float32)
    for k in range(3):
        d = ct[:, k:k + 1] - czT[k:k + 1, :]
        d2 = d2 + d * d

    if N % tn != 0:                             # ragged tail: mask invalid rows
        row = lax.broadcasted_iota(jnp.int32, (tn, M), 0) + nt * tn
        d2 = jnp.where(row < N, d2, jnp.inf)

    tmin = jnp.min(d2, axis=0, keepdims=True)                          # (1, M)
    iota_f = lax.broadcasted_iota(jnp.int32, (tn, M), 0).astype(jnp.float32)
    targ = jnp.min(jnp.where(d2 <= tmin, iota_f, jnp.float32(tn)),
                   axis=0, keepdims=True)
    targ = targ + (nt * tn).astype(jnp.float32)                        # global idx

    better = tmin < dmin_ref[...]               # strict <: earlier tile wins ties
    arg_ref[...] = jnp.where(better, targ, arg_ref[...])
    dmin_ref[...] = jnp.where(better, tmin, dmin_ref[...])

    @pl.when(nt == pl.num_programs(1) - 1)
    def _():
        idx_ref[0] = arg_ref[...].astype(jnp.int32)
        mask_ref[0] = (dmin_ref[...] <= max_dist2).astype(jnp.float32)


def nearest_teacher(coord_zT, coord_t, max_dist=4.0):
    """coord_zT: (B, 3, M) student points; coord_t: (B, N, 3) teacher points.
    Returns idx (B, 1, M) int32 and mask (B, 1, M) float32 (lane-dense)."""
    B, _, M = coord_zT.shape
    N = coord_t.shape[1]
    # big teacher tile to amortize per-step overhead, capped so the in-kernel
    # (tn, M) f32 distance tile stays <= ~8 MiB (safe on v7x VMEM)
    tn_cap = max(8, (8 * 1024 * 1024 // (4 * max(M, 1))) // 8 * 8)
    tn = min(2048, tn_cap)
    if N <= tn:
        tn, n_tiles = N, 1
    else:
        n_tiles = _cdiv(N, tn)
    kernel = functools.partial(_nearest_kernel, float(max_dist) ** 2,
                               int(N), int(tn))
    return pl.pallas_call(
        kernel,
        out_shape=(jax.ShapeDtypeStruct((B, 1, M), jnp.int32),
                   jax.ShapeDtypeStruct((B, 1, M), jnp.float32)),
        grid=(B, n_tiles),
        in_specs=[pl.BlockSpec((1, 3, M), lambda b, n: (b, 0, 0)),
                  pl.BlockSpec((1, tn, 3), lambda b, n: (b, n, 0))],
        out_specs=(pl.BlockSpec((1, 1, M), lambda b, n: (b, 0, 0)),
                   pl.BlockSpec((1, 1, M), lambda b, n: (b, 0, 0))),
        scratch_shapes=[pltpu.VMEM((1, M), jnp.float32),
                        pltpu.VMEM((1, M), jnp.float32)],
        compiler_params=pltpu.CompilerParams(
            dimension_semantics=("parallel", "arbitrary"),
            vmem_limit_bytes=32 * 1024 * 1024),
    )(coord_zT, coord_t)


# ----------------------------------------------------------------------------
# Pallas kernel 3: clustered cross-entropy, tiled over M (lane-dense blocks),
# log-softmax over the sublane (P) axis, masked mean accumulated in VMEM
# scratch across M tiles.  Prototypes arrive already normalized (kernel 1).
# ----------------------------------------------------------------------------
def _ce_kernel(temp, ezT_ref, epn_ref, asg_ref, mask_ref, loss_ref,
               num_ref, cnt_ref):
    mt = pl.program_id(1)

    @pl.when(mt == 0)
    def _():
        num_ref[...] = jnp.zeros(num_ref.shape, jnp.float32)
        cnt_ref[...] = jnp.zeros(cnt_ref.shape, jnp.float32)

    ezT = ezT_ref[0]                            # (C, tm), tm lane-dense
    epn = epn_ref[0]                            # (P, C) pre-normalized
    asg = asg_ref[0]                            # (P, tm)
    msk = mask_ref[0]                           # (1, tm)

    z_sumsq = jnp.sum(ezT * ezT, axis=0, keepdims=True)                # (1, tm)
    eznT = ezT * lax.rsqrt(jnp.maximum(z_sumsq, 1e-24))                # (C, tm)

    logits = lax.dot_general(epn.astype(jnp.bfloat16), eznT.astype(jnp.bfloat16),
                             (((1,), (0,)), ((), ())),
                             preferred_element_type=jnp.float32) * (1.0 / temp)  # (P, tm)
    # log-softmax == reference's clamp(log(softmax + 1e-16), -1000, 0): for
    # cosine logits |log-softmax| << 1000 so the clamp / epsilon never bind.
    lmax = jnp.max(logits, axis=0, keepdims=True)
    lse = jnp.log(jnp.sum(jnp.exp(logits - lmax), axis=0, keepdims=True))
    log_sim = logits - lmax - lse                                      # (P, tm)

    ce = -jnp.sum(asg * log_sim, axis=0, keepdims=True)                # (1, tm)
    num_ref[...] = num_ref[...] + jnp.sum(ce * msk, keepdims=True)
    cnt_ref[...] = cnt_ref[...] + jnp.sum(msk, keepdims=True)

    @pl.when(mt == pl.num_programs(1) - 1)
    def _():
        # masked mean; guarded against zero valid points (torch would be NaN)
        loss = num_ref[...] / jnp.maximum(cnt_ref[...], 1.0)
        loss_ref[0] = jnp.broadcast_to(loss, (8, 128))


def clustered_ce_loss(emb_zT, emb_pn, assignment, mask, temp, tm):
    """emb_zT (B, C, M), emb_pn (B, P, C), assignment (B, P, M), mask (B, 1, M)."""
    B, C, M = emb_zT.shape
    P = emb_pn.shape[1]
    mt = M // tm
    kernel = functools.partial(_ce_kernel, float(temp))
    out = pl.pallas_call(
        kernel,
        out_shape=jax.ShapeDtypeStruct((B, 8, 128), jnp.float32),
        grid=(B, mt),
        in_specs=[pl.BlockSpec((1, C, tm), lambda b, m: (b, 0, m)),
                  pl.BlockSpec((1, P, C), lambda b, m: (b, 0, 0)),
                  pl.BlockSpec((1, P, tm), lambda b, m: (b, 0, m)),
                  pl.BlockSpec((1, 1, tm), lambda b, m: (b, 0, m))],
        out_specs=pl.BlockSpec((1, 8, 128), lambda b, m: (b, 0, 0)),
        scratch_shapes=[pltpu.VMEM((1, 1), jnp.float32),
                        pltpu.VMEM((1, 1), jnp.float32)],
        compiler_params=pltpu.CompilerParams(
            dimension_semantics=("parallel", "arbitrary"),
            vmem_limit_bytes=32 * 1024 * 1024),
    )(emb_zT, emb_pn, assignment, mask)
    return out[:, 0, 0]                                                # (B,)


# ----------------------------------------------------------------------------
# Module wrapper (mirrors ClusteredPrototypeLoss.forward)
# ----------------------------------------------------------------------------
class ClusteredPrototypeLoss:
    def __init__(self, reduction_factor=8.0, k_means_iterations=3, fwhm=128.0):
        self.reduction_factor = reduction_factor
        self.k_means_iterations = k_means_iterations
        self.fwhm = fwhm

    def __call__(self, emb_s, emb_t, coord_s, coord_t,
                 temp_s=0.066, temp_t=0.033, jitters=None):
        n_students = len(emb_s)
        if jitters is None:
            jitters = [(0, 0, 0, 0, 0, 0)] * n_students

        # sampling (glue)
        emb_pT, coord_p5 = sample_embedding(emb_t, coord_t, self.reduction_factor * 2)
        emb_tT, coord_t5 = sample_embedding(emb_t, coord_t, self.reduction_factor)

        B, C, N = emb_tT.shape
        P = emb_pT.shape[2]
        sigma2 = (self.fwhm / 2.355) ** 2

        coord_tT = coord_t5.reshape(B, 3, -1)                        # (B, 3, N)
        coord_t_rows = jnp.transpose(coord_tT, (0, 2, 1))            # (B, N, 3)
        emb_p0 = jnp.transpose(emb_pT, (0, 2, 1))                    # (B, P, C)
        coord_p0 = jnp.transpose(coord_p5.reshape(B, 3, -1), (0, 2, 1))  # (B, P, 3)

        # X^T = [emb_t | coord_t | 1] stacked on the channel (sublane) axis;
        # N stays lane-dense so every (.,N) vreg in kernel 1 is fully used.
        x = jnp.concatenate([emb_tT, coord_tT, jnp.ones((B, 1, N), jnp.float32)],
                            axis=1)                                   # (B, C+4, N)
        sim_t_p, emb_pn = cluster_prototypes(x, emb_p0, coord_p0,
                                             self.k_means_iterations,
                                             temp_t, sigma2)          # (B,P,N), (B,P,C)

        total_loss = jnp.float32(0.0)
        for i in range(n_students):
            ezT, c = sample_embedding(emb_s[i], coord_s[i], self.reduction_factor,
                                      jitter=jitters[i])              # (B, C, M)
            czT = c.reshape(B, 3, -1)                                 # (B, 3, M)
            M = ezT.shape[2]
            if M <= 2048:
                tm, mpad = M, M
            else:
                tm = 2048
                mpad = _round_up(M, tm)
            pad = mpad - M
            if pad:
                # padded points sit far away -> masked out (no loss contribution)
                ezT = jnp.pad(ezT, ((0, 0), (0, 0), (0, pad)))
                czT = jnp.pad(czT, ((0, 0), (0, 0), (0, pad)), constant_values=1e6)

            idx, mask = nearest_teacher(czT, coord_t_rows)            # (B,1,M) i32/f32
            # TODO(synk): per-row dynamic gather sim_t_p[b, :, idx[b, m]] has no
            # robust Pallas TPU lowering; done with an XLA lane-axis gather.
            idx_b = jnp.broadcast_to(idx[:, 0, :][:, None, :], (B, P, mpad))
            assignment = jnp.take_along_axis(sim_t_p, idx_b, axis=2)  # (B, P, M)

            loss_b = clustered_ce_loss(ezT, emb_pn, assignment, mask, temp_s, tm)
            total_loss = total_loss + jnp.mean(loss_b)
        return total_loss


# ----------------------------------------------------------------------------
# Main
# ----------------------------------------------------------------------------
if __name__ == "__main__":
    key = jax.random.PRNGKey(0)
    B, C = 2, 16
    H = W = D = 16
    reduction_factor = 4.0
    n_students = 2

    k_emb_t, k_emb_s = jax.random.split(key, 2)
    emb_t = jax.random.normal(k_emb_t, (B, C, H, W, D), jnp.float32)
    emb_s = [jax.random.normal(k, (B, C, H, W, D), jnp.float32)
             for k in jax.random.split(k_emb_s, n_students)]

    # world coordinates = voxel-index meshgrid (same frame for teacher / students)
    gx, gy, gz = jnp.meshgrid(jnp.arange(H, dtype=jnp.float32),
                              jnp.arange(W, dtype=jnp.float32),
                              jnp.arange(D, dtype=jnp.float32), indexing="ij")
    coord = jnp.broadcast_to(jnp.stack([gx, gy, gz], axis=0)[None],
                             (B, 3, H, W, D))
    coord_t = coord
    coord_s = [coord for _ in range(n_students)]

    # deterministic spatial jitter (replaces torch.randint)
    rng = np.random.default_rng(0)
    hi = int(math.ceil(reduction_factor))
    jitters = [tuple(int(v) for v in rng.integers(0, hi, size=6))
               for _ in range(n_students)]

    loss_mod = ClusteredPrototypeLoss(reduction_factor=reduction_factor,
                                      k_means_iterations=3, fwhm=128.0)
    out = loss_mod(emb_s, emb_t, coord_s, coord_t, jitters=jitters)
    out = jax.block_until_ready(out)
    print("KERNEL_OK")
</pallas_src>

<mosaic_0001>
module attributes {stable_mosaic.version = 11 : i64} {
  func.func @_cluster_kernel(%arg0: i32, %arg1: memref<1x20x64xf32, #tpu.memory_space<vmem>>, %arg2: memref<1x8x16xf32, #tpu.memory_space<vmem>>, %arg3: memref<1x8x3xf32, #tpu.memory_space<vmem>>, %arg4: memref<1x8x64xf32, #tpu.memory_space<vmem>>, %arg5: memref<1x8x16xf32, #tpu.memory_space<vmem>>) attributes {dimension_semantics = [#tpu.dimension_semantics<parallel>], iteration_bounds = array<i64: 2>, scalar_prefetch = 0 : i64, scratch_operands = 0 : i64, tpu.core_type = #tpu.core_type<tc>, window_params = [{transform_indices = @transform_0, window_bounds = array<i64: 1, 20, 64>}, {transform_indices = @transform_1, window_bounds = array<i64: 1, 8, 16>}, {transform_indices = @transform_2, window_bounds = array<i64: 1, 8, 3>}, {transform_indices = @transform_3, window_bounds = array<i64: 1, 8, 64>}, {transform_indices = @transform_4, window_bounds = array<i64: 1, 8, 16>}]} {
    %c0 = arith.constant 0 : index
    %c0_0 = arith.constant 0 : index
    %c0_1 = arith.constant 0 : index
    %0 = vector.load %arg1[%c0, %c0_0, %c0_1] : memref<1x20x64xf32, #tpu.memory_space<vmem>>, vector<1x20x64xf32>
    %1 = vector.shape_cast %0 : vector<1x20x64xf32> to vector<20x64xf32>
    %2 = vector.extract_strided_slice %1 {offsets = [0, 0], sizes = [16, 64], strides = [1, 1]} : vector<20x64xf32> to vector<16x64xf32>
    %3 = vector.extract_strided_slice %1 {offsets = [16, 0], sizes = [3, 64], strides = [1, 1]} : vector<20x64xf32> to vector<3x64xf32>
    %4 = arith.mulf %2, %2 : vector<16x64xf32>
    %cst = arith.constant dense<0.000000e+00> : vector<64xf32>
    %5 = vector.multi_reduction <add>, %4, %cst [0] : vector<16x64xf32> to vector<64xf32>
    %6 = vector.shape_cast %5 : vector<64xf32> to vector<1x64xf32>
    %cst_2 = arith.constant 1.000000e-24 : f32
    %7 = vector.broadcast %cst_2 : f32 to vector<1x64xf32>
    %8 = arith.maximumf %6, %7 : vector<1x64xf32>
    %9 = math.rsqrt %8 : vector<1x64xf32>
    %10 = vector.broadcast %9 : vector<1x64xf32> to vector<16x64xf32>
    %11 = arith.mulf %2, %10 : vector<16x64xf32>
    %12 = arith.truncf %11 : vector<16x64xf32> to vector<16x64xbf16>
    %13 = arith.truncf %1 : vector<20x64xf32> to vector<20x64xbf16>
    %14 = arith.mulf %3, %3 : vector<3x64xf32>
    %cst_3 = arith.constant dense<0.000000e+00> : vector<64xf32>
    %15 = vector.multi_reduction <add>, %14, %cst_3 [0] : vector<3x64xf32> to vector<64xf32>
    %16 = vector.shape_cast %15 : vector<64xf32> to vector<1x64xf32>
    %c0_4 = arith.constant 0 : index
    %c0_5 = arith.constant 0 : index
    %c0_6 = arith.constant 0 : index
    %17 = vector.load %arg2[%c0_4, %c0_5, %c0_6] : memref<1x8x16xf32, #tpu.memory_space<vmem>>, vector<1x8x16xf32>
    %18 = vector.shape_cast %17 : vector<1x8x16xf32> to vector<8x16xf32>
    %c0_7 = arith.constant 0 : index
    %c0_8 = arith.constant 0 : index
    %c0_9 = arith.constant 0 : index
    %19 = vector.load %arg3[%c0_7, %c0_8, %c0_9] : memref<1x8x3xf32, #tpu.memory_space<vmem>>, vector<1x8x3xf32>
    %20 = vector.shape_cast %19 : vector<1x8x3xf32> to vector<8x3xf32>
    %c0_i32 = arith.constant 0 : i32
    %c3_i32 = arith.constant 3 : i32
    %21 = arith.addi %c0_i32, %c3_i32 : i32
    %c1_i32 = arith.constant 1 : i32
    %22:2 = scf.for %arg6 = %c0_i32 to %21 step %c1_i32 iter_args(%arg7 = %18, %arg8 = %20) -> (vector<8x16xf32>, vector<8x3xf32>)  : i32 {
      %69 = arith.mulf %arg7, %arg7 : vector<8x16xf32>
      %cst_28 = arith.constant dense<0.000000e+00> : vector<8xf32>
      %70 = vector.multi_reduction <add>, %69, %cst_28 [1] : vector<8x16xf32> to vector<8xf32>
      %71 = vector.shape_cast %70 : vector<8xf32> to vector<8x1xf32>
      %cst_29 = arith.constant 1.000000e-24 : f32
      %72 = vector.broadcast %cst_29 : f32 to vector<8x1xf32>
      %73 = arith.maximumf %71, %72 : vector<8x1xf32>
      %74 = math.rsqrt %73 : vector<8x1xf32>
      %75 = vector.broadcast %74 : vector<8x1xf32> to vector<8x16xf32>
      %76 = arith.mulf %arg7, %75 : vector<8x16xf32>
      %77 = arith.truncf %76 : vector<8x16xf32> to vector<8x16xbf16>
      %cst_30 = arith.constant dense<0.000000e+00> : vector<8x64xf32>
      %78 = tpu.matmul %77, %12, %cst_30 {dimension_numbers = #tpu.dot_dimension_numbers<[1], [0], [0], [1], [0, 0, 1, 1], [], []>} : vector<8x16xbf16>, vector<16x64xbf16>, vector<8x64xf32> -> vector<8x64xf32>
      %cst_31 = arith.constant 30.30303 : f32
      %79 = vector.broadcast %cst_31 : f32 to vector<8x64xf32>
      %80 = arith.mulf %78, %79 : vector<8x64xf32>
      %cst_32 = arith.constant dense<0xFF800000> : vector<64xf32>
      %81 = vector.multi_reduction <maximumf>, %80, %cst_32 [0] : vector<8x64xf32> to vector<64xf32>
      %82 = vector.shape_cast %81 : vector<64xf32> to vector<1x64xf32>
      %83 = vector.broadcast %82 : vector<1x64xf32> to vector<8x64xf32>
      %84 = arith.subf %80, %83 : vector<8x64xf32>
      %85 = math.exp %84 : vector<8x64xf32>
      %cst_33 = arith.constant dense<0.000000e+00> : vector<64xf32>
      %86 = vector.multi_reduction <add>, %85, %cst_33 [0] : vector<8x64xf32> to vector<64xf32>
      %87 = vector.shape_cast %86 : vector<64xf32> to vector<1x64xf32>
      %88 = tpu.reciprocal %87 {approx = true} : vector<1x64xf32> -> vector<1x64xf32>
      %89 = vector.broadcast %88 : vector<1x64xf32> to vector<8x64xf32>
      %90 = arith.mulf %85, %89 : vector<8x64xf32>
      %91 = arith.mulf %arg8, %arg8 : vector<8x3xf32>
      %cst_34 = arith.constant dense<0.000000e+00> : vector<8xf32>
      %92 = vector.multi_reduction <add>, %91, %cst_34 [1] : vector<8x3xf32> to vector<8xf32>
      %93 = vector.shape_cast %92 : vector<8xf32> to vector<8x1xf32>
      %cst_35 = arith.constant dense<0.000000e+00> : vector<8x64xf32>
      %94 = tpu.matmul %arg8, %3, %cst_35 {dimension_numbers = #tpu.dot_dimension_numbers<[1], [0], [0], [1], [0, 0, 1, 1], [], []>} : vector<8x3xf32>, vector<3x64xf32>, vector<8x64xf32> -> vector<8x64xf32>
      %95 = vector.broadcast %93 : vector<8x1xf32> to vector<8x64xf32>
      %96 = vector.broadcast %16 : vector<1x64xf32> to vector<8x64xf32>
      %97 = arith.addf %95, %96 : vector<8x64xf32>
      %cst_36 = arith.constant 2.000000e+00 : f32
      %98 = vector.broadcast %cst_36 : f32 to vector<8x64xf32>
      %99 = arith.mulf %98, %94 : vector<8x64xf32>
      %100 = arith.subf %97, %99 : vector<8x64xf32>
      %cst_37 = arith.constant 0.000000e+00 : f32
      %101 = vector.broadcast %cst_37 : f32 to vector<8x64xf32>
      %102 = arith.maximumf %100, %101 : vector<8x64xf32>
      %cst_38 = arith.constant 0.000000e+00 : f32
      %103 = vector.broadcast %cst_38 : f32 to vector<8x64xf32>
      %104 = arith.subf %103, %102 : vector<8x64xf32>
      %cst_39 = arith.constant 1.69251245E-4 : f32
      %105 = vector.broadcast %cst_39 : f32 to vector<8x64xf32>
      %106 = arith.mulf %104, %105 : vector<8x64xf32>
      %107 = math.exp %106 : vector<8x64xf32>
      %108 = arith.mulf %90, %107 : vector<8x64xf32>
      %109 = arith.truncf %108 : vector<8x64xf32> to vector<8x64xbf16>
      %cst_40 = arith.constant dense<0.000000e+00> : vector<8x20xf32>
      %110 = tpu.matmul %109, %13, %cst_40 {dimension_numbers = #tpu.dot_dimension_numbers<[1], [1], [0], [0], [0, 0, 1, 0], [], []>} : vector<8x64xbf16>, vector<20x64xbf16>, vector<8x20xf32> -> vector<8x20xf32>
      %111 = vector.extract_strided_slice %110 {offsets = [0, 19], sizes = [8, 1], strides = [1, 1]} : vector<8x20xf32> to vector<8x1xf32>
      %cst_41 = arith.constant 9.99999996E-13 : f32
      %112 = vector.broadcast %cst_41 : f32 to vector<8x1xf32>
      %113 = arith.maximumf %111, %112 : vector<8x1xf32>
      %cst_42 = arith.constant 1.000000e+00 : f32
      %114 = vector.broadcast %cst_42 : f32 to vector<8x1xf32>
      %115 = arith.divf %114, %113 : vector<8x1xf32>
      %116 = vector.extract_strided_slice %110 {offsets = [0, 0], sizes = [8, 16], strides = [1, 1]} : vector<8x20xf32> to vector<8x16xf32>
      %117 = vector.broadcast %115 : vector<8x1xf32> to vector<8x16xf32>
      %118 = arith.mulf %116, %117 : vector<8x16xf32>
      %119 = vector.extract_strided_slice %110 {offsets = [0, 16], sizes = [8, 3], strides = [1, 1]} : vector<8x20xf32> to vector<8x3xf32>
      %120 = vector.broadcast %115 : vector<8x1xf32> to vector<8x3xf32>
      %121 = arith.mulf %119, %120 : vector<8x3xf32>
      scf.yield %118, %121 : vector<8x16xf32>, vector<8x3xf32>
    }
    %23 = arith.mulf %22#0, %22#0 : vector<8x16xf32>
    %cst_10 = arith.constant dense<0.000000e+00> : vector<8xf32>
    %24 = vector.multi_reduction <add>, %23, %cst_10 [1] : vector<8x16xf32> to vector<8xf32>
    %25 = vector.shape_cast %24 : vector<8xf32> to vector<8x1xf32>
    %cst_11 = arith.constant 1.000000e-24 : f32
    %26 = vector.broadcast %cst_11 : f32 to vector<8x1xf32>
    %27 = arith.maximumf %25, %26 : vector<8x1xf32>
    %28 = math.rsqrt %27 : vector<8x1xf32>
    %29 = vector.broadcast %28 : vector<8x1xf32> to vector<8x16xf32>
    %30 = arith.mulf %22#0, %29 : vector<8x16xf32>
    %31 = arith.truncf %30 : vector<8x16xf32> to vector<8x16xbf16>
    %cst_12 = arith.constant dense<0.000000e+00> : vector<8x64xf32>
    %32 = tpu.matmul %31, %12, %cst_12 {dimension_numbers = #tpu.dot_dimension_numbers<[1], [0], [0], [1], [0, 0, 1, 1], [], []>} : vector<8x16xbf16>, vector<16x64xbf16>, vector<8x64xf32> -> vector<8x64xf32>
    %cst_13 = arith.constant 30.30303 : f32
    %33 = vector.broadcast %cst_13 : f32 to vector<8x64xf32>
    %34 = arith.mulf %32, %33 : vector<8x64xf32>
    %cst_14 = arith.constant dense<0xFF800000> : vector<64xf32>
    %35 = vector.multi_reduction <maximumf>, %34, %cst_14 [0] : vector<8x64xf32> to vector<64xf32>
    %36 = vector.shape_cast %35 : vector<64xf32> to vector<1x64xf32>
    %37 = vector.broadcast %36 : vector<1x64xf32> to vector<8x64xf32>
    %38 = arith.subf %34, %37 : vector<8x64xf32>
    %39 = math.exp %38 : vector<8x64xf32>
    %cst_15 = arith.constant dense<0.000000e+00> : vector<64xf32>
    %40 = vector.multi_reduction <add>, %39, %cst_15 [0] : vector<8x64xf32> to vector<64xf32>
    %41 = vector.shape_cast %40 : vector<64xf32> to vector<1x64xf32>
    %42 = tpu.reciprocal %41 {approx = true} : vector<1x64xf32> -> vector<1x64xf32>
    %43 = vector.broadcast %42 : vector<1x64xf32> to vector<8x64xf32>
    %44 = arith.mulf %39, %43 : vector<8x64xf32>
    %45 = arith.mulf %22#1, %22#1 : vector<8x3xf32>
    %cst_16 = arith.constant dense<0.000000e+00> : vector<8xf32>
    %46 = vector.multi_reduction <add>, %45, %cst_16 [1] : vector<8x3xf32> to vector<8xf32>
    %47 = vector.shape_cast %46 : vector<8xf32> to vector<8x1xf32>
    %cst_17 = arith.constant dense<0.000000e+00> : vector<8x64xf32>
    %48 = tpu.matmul %22#1, %3, %cst_17 {dimension_numbers = #tpu.dot_dimension_numbers<[1], [0], [0], [1], [0, 0, 1, 1], [], []>} : vector<8x3xf32>, vector<3x64xf32>, vector<8x64xf32> -> vector<8x64xf32>
    %49 = vector.broadcast %47 : vector<8x1xf32> to vector<8x64xf32>
    %50 = vector.broadcast %16 : vector<1x64xf32> to vector<8x64xf32>
    %51 = arith.addf %49, %50 : vector<8x64xf32>
    %cst_18 = arith.constant 2.000000e+00 : f32
    %52 = vector.broadcast %cst_18 : f32 to vector<8x64xf32>
    %53 = arith.mulf %52, %48 : vector<8x64xf32>
    %54 = arith.subf %51, %53 : vector<8x64xf32>
    %cst_19 = arith.constant 0.000000e+00 : f32
    %55 = vector.broadcast %cst_19 : f32 to vector<8x64xf32>
    %56 = arith.maximumf %54, %55 : vector<8x64xf32>
    %cst_20 = arith.constant 0.000000e+00 : f32
    %57 = vector.broadcast %cst_20 : f32 to vector<8x64xf32>
    %58 = arith.subf %57, %56 : vector<8x64xf32>
    %cst_21 = arith.constant 1.69251245E-4 : f32
    %59 = vector.broadcast %cst_21 : f32 to vector<8x64xf32>
    %60 = arith.mulf %58, %59 : vector<8x64xf32>
    %61 = math.exp %60 : vector<8x64xf32>
    %62 = arith.mulf %44, %61 : vector<8x64xf32>
    %c0_22 = arith.constant 0 : index
    %c0_23 = arith.constant 0 : index
    %c0_24 = arith.constant 0 : index
    %63 = vector.load %arg4[%c0_22, %c0_23, %c0_24] : memref<1x8x64xf32, #tpu.memory_space<vmem>>, vector<1x8x64xf32>
    %64 = vector.shape_cast %63 : vector<1x8x64xf32> to vector<8x64xf32>
    %65 = vector.shape_cast %62 : vector<8x64xf32> to vector<1x8x64xf32>
    tpu.vector_store %arg4[%c0_22, %c0_23, %c0_24], %65 {strides = array<i32>} : memref<1x8x64xf32, #tpu.memory_space<vmem>>, vector<1x8x64xf32>,
    %c0_25 = arith.constant 0 : index
    %c0_26 = arith.constant 0 : index
    %c0_27 = arith.constant 0 : index
    %66 = vector.load %arg5[%c0_25, %c0_26, %c0_27] : memref<1x8x16xf32, #tpu.memory_space<vmem>>, vector<1x8x16xf32>
    %67 = vector.shape_cast %66 : vector<1x8x16xf32> to vector<8x16xf32>
    %68 = vector.shape_cast %30 : vector<8x16xf32> to vector<1x8x16xf32>
    tpu.vector_store %arg5[%c0_25, %c0_26, %c0_27], %68 {strides = array<i32>} : memref<1x8x16xf32, #tpu.memory_space<vmem>>, vector<1x8x16xf32>,
    return
  }
  func.func @transform_0(%arg0: i32) -> (i32, i32, i32) {
    %c0_i32 = arith.constant 0 : i32
    %c0_i32_0 = arith.constant 0 : i32
    %c0_i32_1 = arith.constant 0 : i32
    return %arg0, %c0_i32, %c0_i32_0 : i32, i32, i32
  }
  func.func @transform_1(%arg0: i32) -> (i32, i32, i32) {
    %c0_i32 = arith.constant 0 : i32
    %c0_i32_0 = arith.constant 0 : i32
    %c0_i32_1 = arith.constant 0 : i32
    return %arg0, %c0_i32, %c0_i32_0 : i32, i32, i32
  }
  func.func @transform_2(%arg0: i32) -> (i32, i32, i32) {
    %c0_i32 = arith.constant 0 : i32
    %c0_i32_0 = arith.constant 0 : i32
    %c0_i32_1 = arith.constant 0 : i32
    return %arg0, %c0_i32, %c0_i32_0 : i32, i32, i32
  }
  func.func @transform_3(%arg0: i32) -> (i32, i32, i32) {
    %c0_i32 = arith.constant 0 : i32
    %c0_i32_0 = arith.constant 0 : i32
    %c0_i32_1 = arith.constant 0 : i32
    return %arg0, %c0_i32, %c0_i32_0 : i32, i32, i32
  }
  func.func @transform_4(%arg0: i32) -> (i32, i32, i32) {
    %c0_i32 = arith.constant 0 : i32
    %c0_i32_0 = arith.constant 0 : i32
    %c0_i32_1 = arith.constant 0 : i32
    return %arg0, %c0_i32, %c0_i32_0 : i32, i32, i32
  }
}

</mosaic_0001>

<bundles_post_ra>
// kernel: tpu_custom_call.1
= control target key start
LH: loop header
LB: loop body
LE: loop exit
PB: predicated region body
PF: predicated region fallthrough
CT: control target
= control target key end

     0   :  { %10 = vsyncpa [#allocation3], 0  ;;  %s1346_s0 = inlined_call_operand.vmem [shape: f32[2,20,64], index: 0, kind: input, shape index: {}]   ;;  %s1347_s1 = inlined_call_operand.vmem [shape: f32[2,8,16], index: 1, kind: input, shape index: {}]   ;;  %s1348_s2 = inlined_call_operand.vmem [shape: f32[2,8,3], index: 2, kind: input, shape index: {}]   ;;  %s1349_s3 = inlined_call_operand.hbm [shape: f32[2,8,64], index: 3, kind: output, shape index: {0}]   ;;  %s1350_s4 = inlined_call_operand.hbm [shape: f32[2,8,16], index: 4, kind: output, shape index: {1}]  }
   0x1   :  { %12 = vsyncpa [#allocation3 + $0x1], 0 }
   0x2   :  { %13 = vsyncpa [#allocation5], 0 }
   0x3   :  { %15 = vsyncpa [#allocation5 + $0x1], 0  ;;  %s1141_s15 = smov 0   ;;  %s1143_s16 = smov 0  }
   0x4   :  { %s1145_s17 = smov 0   ;;  %s1147_s18 = smov 0  }
   0x5 LB: > { %s1162_s19 = sadd.s32 4294967295, %s1094_s18   ;;  %s832_s20 = sadd.s32 4294967294, %s1094_s18   ;;  %s1094_s18 = sphi %s1147_s18, %s1358_s18   ;;  %s1090_s17 = sphi %s1145_s17, %s1357_s17   ;;  %s1086_s16 = sphi %s1143_s16, %s1356_s16   ;;  %s1082_s15 = sphi %s1141_s15, %s1355_s15  }
   0x6   : > { %s1166_s21 = sadd.s32 1, %s1094_s18   ;;  %s106_s22 = sadd.s32 1, %s1090_s17 }
   0x7   : > { %s103_s23 = ssub.s32 %s1094_s18, %s1166_s21  ;;  %p116_p0 = scmp.ne.s32.totalorder %s1090_s17, %s1086_s16 }
   0x8   : > { %p104_p1 = scmp.eq.s32.totalorder %s103_s23, 0  ;;  %p117_p2 = scmp.eq.s32.totalorder %s1162_s19, 1 }
   0x9   : > { %p122_p3 = scmp.ne.s32.totalorder %s1086_s16, %s1082_s15  ;;  %p123_p4 = scmp.eq.s32.totalorder %s832_s20, 1 }
   0xa   : > { %s1177_s24 = scalar_select %p104_p1, %s1090_s17, %s106_s22  }
   0xb   : > { %p1179_p5 = por %p117_p2, %p116_p0  ;;  %p1183_p6 = por %p123_p4, %p122_p3 }
   0xc   : > { %p835_p7 = scmp.ge.s32.totalorder %s1094_s18, 1  ;;  %p189_p8 = scmp.lt.s32.totalorder %s1094_s18, 3 }
   0xe   : > { %p190_p9 = pnand %p835_p7, %p189_p8 }
   0xf   : > { %s1190_s27 = sand.u32 (!%p190_p9), 1, %s1086_s16   ;;  %p228_p10 = scmp.lt.s32.totalorder (!%p190_p9), %s1162_s19, 1 }
  0x10   : > { %193 = sbr.rel (%p190_p9) target bundleno = 1250 (0x4e2), region = 32  ;;  %s836_s28 = sshll.u32 (!%p190_p9), %s1190_s27, 3 }
  0x11   : > { %s1230_s20 = scalar_lea.vmem (!%p190_p9), [#allocation2], %s836_s28  ;;  %s1234_s22 = scalar_lea.vmem (!%p190_p9), [#allocation4], %s836_s28 }
  0x12   : > { %s1240_s23 = smov (!%p190_p9), 0  }
  0x15   : > { %s229_s29 = scalar_select %p228_p10, %s1162_s19, 1  ;;  %vm247_vm0 = vcmask 523264   ;;  %vm265_vm1 = vcmask 518144  }
  0x17   : > { %s895_s30 = smul.u32 24, %s229_s29  ;;  %s839_s5 = sshll.u32 %s229_s29, 3 }
  0x18   : > { %s236_s8 = scalar_lea.vmem %s1347_s1, %s839_s5  ;;  %s240_s11 = scalar_lea.vmem %s1348_s2, %s839_s5 }
  0x19   : > { %s232_s14 = scalar_lea.vmem %s1346_s0, %s895_s30  ;;  %v273_v0 = vld [vmem:[%s236_s8] sm:$0xff]  }
  0x1a   : > { %v274_v1 = vld [vmem:[%s240_s11] sm:$0xff]   ;;  %v1206_v3 = vld [vmem:[%s232_s14 + $0x8] sm:$0xff]  ;;  %v1208_v4 = vld [vmem:[%s232_s14 + $0x10] sm:$0xf] }
  0x1b   : > { %v1204_v2 = vld [vmem:[%s232_s14] sm:$0xff]  ;;  %v246_v6 = vmul.f32 %v1206_v3, %v1206_v3  ;;  %v263_v8 = vpack.c.bf16 %v1208_v4, %v1208_v4  ;;  %v264_v9 = vmul.f32 %v1208_v4, %v1208_v4 }
  0x1c   : > { %v245_v5 = vmul.f32 %v1204_v2, %v1204_v2  ;;  %v262_v7 = vpack.c.bf16 %v1206_v3, %v1204_v2 }
  0x1d   : > { %v249_v11 = vsel %vm247_vm0, %v246_v6, 0.0  ;;  %v266_v13 = vsel %vm265_vm1, %v264_v9, 0.0 }
  0x1e   : > { %v248_v10 = vsel %vm247_vm0, %v245_v5, 0.0  ;;  %v267_v14 = vrot.slane %v266_v13, 4 }
  0x1f   : > { %v250_v12 = vadd.f32 %v249_v11, %v248_v10 }
  0x20   : > { %v268_v16 = vadd.f32 %v267_v14, %v266_v13 }
  0x21   : > { %v251_v15 = vrot.slane %v250_v12, 4 }
  0x22   : > { %v269_v18 = vrot.slane %v268_v16, 2 }
  0x23   : > { %v252_v17 = vadd.f32 %v251_v15, %v250_v12 }
  0x24   : > { %v270_v20 = vadd.f32 %v269_v18, %v268_v16 }
  0x25   : > { %v253_v19 = vrot.slane %v252_v17, 2 }
  0x26   : > { %v271_v22 = vrot.slane %v270_v20, 1 }
  0x27   : > { %v254_v21 = vadd.f32 %v253_v19, %v252_v17 }
  0x28   : > { %v1222_v24 = vadd.f32 %v271_v22, %v270_v20 }
  0x29   : > { %v255_v23 = vrot.slane %v254_v21, 1 }
  0x2b   : > { %v256_v25 = vadd.f32 %v255_v23, %v254_v21 }
  0x2d   : > { %v257_v26 = vmax.f32 %v256_v25, 1e-24 }
  0x2f   : > { %970 = vrsqrt.f32 %v257_v26 }
  0x3c   : > { %v971_v27 = vpop.eup %970 }
  0x3d   : > { %v259_v28 = vmul.f32 %v971_v27, %v1204_v2  ;;  %v260_v29 = vmul.f32 %v971_v27, %v1206_v3 }
  0x3f   : > { %v1226_v30 = vpack.c.bf16 %v260_v29, %v259_v28 }
  0x40 LB: >> { %vm284_vm2 = vcmask 130048   ;;  %v283_v31 = vmul.f32 %v1102_v0, %v1102_v0  ;;  %v1108_v33 = vmov 0.0   ;;  %vm1109_vm3 = vmmov 0   ;;  %s1111_s28 = smov 112   ;;  %s280_s23 = sadd.s32 1, %s1106_s23   ;;  %s1106_s23 = sphi %s1240_s23, %s280_s23   ;;  %v1102_v0 = vphi %v273_v0, %v1354_v0   ;;  %v1098_v1 = vphi %v274_v1, %v1353_v1  }
  0x41   : >> { %865 = vmatprep.subr.bf16.mxu0 %v1108_v33  ;;  %867 = vmatprep.mubr.msk.bf16.mxu0 %vm1109_vm3, %v1108_v33  ;;  %v355_v34 = vmul.f32 %v1098_v1, %v1098_v1  ;;  %vm356_vm4 = vcmask 23552   ;;  %vm363_vm5 = vcmask 1042432   ;;  %v454_v41 = vsel %vm247_vm0, %v263_v8, 0  ;;  %p277_p11 = scmp.ge.s32.totalorder %s280_s23, 3  }
  0x42   : >> { %v285_v32 = vsel %vm284_vm2, %v283_v31, 0.0  ;;  %866 = vmatpush3.bf16.msra.mxu0 %v1226_v30  ;;  %876 = vmatprep.subr.bf16.mxu1 %v1108_v33  ;;  %v451_v42 = vsel %vm247_vm0, %v262_v7, 0  ;;  %v1110_v21 = vmov 19   ;;  %vm1113_vm6 = vmmov (%p277_p11), 0   ;;  %s850_s29 = sshll.u32 (%p277_p11), %s1162_s19, 7  ;;  %s706_s7 = sshll.u32 (%p277_p11), %s1234_s22, 4  ;;  %s707_s7 = int_to_ptr.vmem [resolvable:$true] %s706_s7 }
  0x43   : >> { %286 = vadd.xlane.f32.xlu0 %v285_v32  ;;  %871 = vmatprep.subr.mxu0 %v1108_v33  ;;  %v357_v35 = vsel %vm356_vm4, %v355_v34, 0.0  ;;  %s704_s6 = scalar_lea.hbm (%p277_p11), %s1350_s4, %s850_s29  ;;  %s680_s8 = scalar_lea.sflag (%p277_p11), [#allocation5], %s1190_s27 }
  0x44   : >> { %880 = vmatprep.mubr.msk.bf16.mxu1 %vm1109_vm3, %v1108_v33  ;;  %877 = vmatpush3.bf16.xpose.msra.mxu1 %v454_v41  ;;  %s992_s9 = scalar_lea.vmem (%p277_p11), %s707_s7, 128  ;;  %s1114_s10 = smov (%p277_p11), [#allocation4]  }
  0x45   : >> { %878 = vmatprep.subr.bf16.mxu1 %v1108_v33  ;;  %972 = vset.pattern.permute.xlu1 %v1110_v21  ;;  %p993_p12 = scmp.ne.s32.totalorder (%p277_p11), %s707_s7, %s992_s9  ;;  %s996_s11 = sshll.u32 (%p277_p11), %s1114_s10, 4  ;;  %s997_s11 = int_to_ptr.vmem [resolvable:$false] %s996_s11 }
  0x46   : >> { %973 = vset.pattern.permute.xlu0 %v1110_v21  ;;  %s998_s12 = scalar_lea.vmem (%p277_p11), %s997_s11, 256  ;;  %p999_p1 = scmp.lt.s32.totalorder (%p277_p11), %s707_s7, %s997_s11 }
  0x47   : >> { %358 = vadd.xlane.f32.xlu0 %v357_v35  ;;  %v1112_v35 = vmov (%p277_p11), 0.0   ;;  %p994_p13 = pnand (%p277_p11), %p993_p12, %p1179_p5  ;;  %p1000_p2 = scmp.lt.s32.totalorder (%p277_p11), %s998_s12, %s992_s9 }
  0x49   : > { %p995_p0 = pneg (%p277_p11), %p994_p13  ;;  %p1001_p3 = por (%p277_p11), %p1000_p2, %p999_p1 }
  0x4b   : > { %p1002_p4 = pnand (%p277_p11), %p1001_p3, %p995_p0 }
  0x4c   : >> { %879 = vmatpush3.bf16.xpose.msra.mxu1 %v451_v42 }
  0x4d   : > { %890 = vmatprep.subr.mxu1 (%p277_p11), %v1112_v35 }
  0xcc   : >> { %v287_v36 = vpop.xlane.xlu0 %286 }
  0xcd   : >> { %v288_v37 = vmax.f32 %v287_v36, 1e-24 }
  0xcf   : >> { %974 = vrsqrt.f32 %v288_v37 }
  0xd0   : >> { %v359_v59 = vpop.xlane.xlu0 %358 }
  0xd1   : >> { %v437_v61 = vadd.f32 %v359_v59, %v1222_v24 }
  0xdc   : >> { %v975_v38 = vpop.eup %974 }
  0xdd   : >> { %v290_v39 = vmul.f32 %v1102_v0, %v975_v38 }
  0xdf   : >> { %v291_v40 = vpack.c.bf16 %v290_v39, %v290_v39 }
  0xe1   : >> { %868 = vmatmul.mubr.msk.bf16.vlgmr.msra.gmra.mxu0 %vm284_vm2, %v291_v40 }
  0xe2   : >> { %872 = vmatpush3.msk.msra.mxu0 %vm363_vm5, %v1208_v4  ;;  %873 = vmatprep.mubr.msk.f32.mxu0 %vm1109_vm3, %v1108_v33 }
  0xe3   : > { %884 = vmatprep.subr.bf16.mxu0 (%p277_p11), %v1112_v35 }
  0xe9   : >> { %874 = vmatmul.mubr.msk.f32.vlgmr.msra.gmra.mxu0 %vm356_vm4, %v1098_v1 }
  0xea   : > { %885 = vmatpush3.bf16.msra.mxu0 (%p277_p11), %v1226_v30  ;;  %886 = vmatprep.mubr.msk.bf16.mxu0 (%p277_p11), %vm1113_vm6, %v1112_v35 }
 0x1a1   : >> { %v329_v43 = vpop.f32.mrf.mxu0 }
 0x1a2   : >> { %v335_v44 = vmul.f32 30.30303, %v329_v43 }
 0x1a3   : >> { %v869_v45 = vpop.f32.mrf.mxu0 }
 0x1a4   : >> { %v336_v46 = vsel %vm247_vm0, %v335_v44, -inf }
 0x1a5   : >> { %v337_v47 = vrot.slane %v336_v46, 4  ;;  %v332_v48 = vpop.f32.mrf.mxu0 }
 0x1a7   : >> { %v338_v49 = vmax.f32 %v336_v46, %v337_v47  ;;  %v870_v50 = vpop.f32.mrf.mxu0 }
 0x1a9   : >> { %v339_v51 = vrot.slane %v338_v49, 2  ;;  %v433_v52 = vpop.f32.mrf.mxu0 }
 0x1aa   : >> { %v438_v60 = vmul.f32 2.0, %v433_v52 }
 0x1ab   : >> { %v340_v53 = vmax.f32 %v338_v49, %v339_v51  ;;  %v875_v54 = vpop.f32.mrf.mxu0 }
 0x1ac   : >> { %v439_v62 = vsub.f32 %v437_v61, %v438_v60 }
 0x1ad   : >> { %v341_v55 = vrot.slane %v340_v53, 1 }
 0x1ae   : >> { %v440_v63 = vmax.f32 %v439_v62, 0.0 }
 0x1af   : >> { %v342_v56 = vmax.f32 %v340_v53, %v341_v55 }
 0x1b0   : >> { %v441_v5 = vsub.f32 0.0, %v440_v63 }
 0x1b1   : >> { %v343_v57 = vsub.f32 %v335_v44, %v342_v56 }
 0x1b2   : >> { %v442_v10 = vmul.f32 0.00016925125, %v441_v5 }
 0x1b3   : >> { %v344_v58 = vmul.f32 1.442695, %v343_v57 }
 0x1b4   : >> { %v443_v13 = vmul.f32 1.442695, %v442_v10 }
 0x1b5   : >> { %976 = vpow2.f32 %v344_v58 }
 0x1b6   : >> { %978 = vpow2.f32 %v443_v13 }
 0x1c2   : >> { %v977_v0 = vpop.eup %976 }
 0x1c3   : >> { %v346_v1 = vsel %vm247_vm0, %v977_v0, 0.0  ;;  %v979_v16 = vpop.eup %978 }
 0x1c4   : >> { %v347_v6 = vrot.slane %v346_v1, 4 }
 0x1c6   : >> { %v348_v9 = vadd.f32 %v347_v6, %v346_v1 }
 0x1c8   : >> { %v349_v11 = vrot.slane %v348_v9, 2 }
 0x1ca   : >> { %v350_v12 = vadd.f32 %v349_v11, %v348_v9 }
 0x1cc   : >> { %v351_v14 = vrot.slane %v350_v12, 1 }
 0x1ce   : >> { %v352_v15 = vadd.f32 %v351_v14, %v350_v12 }
 0x1d0   : >> { %980 = vrcp.f32 %v352_v15 }
 0x1dd   : >> { %v981_v17 = vpop.eup %980 }
 0x1de   : >> { %v354_v18 = vmul.f32 %v981_v17, %v977_v0 }
 0x1e0   : >> { %v445_v19 = vmul.f32 %v979_v16, %v354_v18 }
 0x1e2   : >> { %v446_v20 = vpack.c.bf16 %v445_v19, %v445_v19 }
 0x1e4   : >> { %881 = vmatmul.mubr.msk.bf16.vlgmr.msra.gmra.mxu1 %vm247_vm0, %v446_v20 }
 0x1e5   : > { %891 = vmatpush3.msk.msra.mxu1 (%p277_p11), %vm363_vm5, %v1208_v4  ;;  %892 = vmatprep.mubr.msk.f32.mxu1 (%p277_p11), %vm1113_vm6, %v1112_v35 }
 0x2a4   : >> { %v490_v22 = vpop.f32.mrf.mxu1 }
 0x2a5   : >> { %v496_v23 = vmax.f32 %v490_v22, 1e-12 }
 0x2a6   : >> { %v882_v25 = vpop.f32.mrf.mxu1 }
 0x2a7   : >> { %982 = vrcp.f32 %v496_v23 }
 0x2a8   : >> { %v493_v26 = vpop.f32.mrf.mxu1 }
 0x2aa   : >> { %v883_v27 = vpop.f32.mrf.mxu1 }
 0x2b4   : >> { %v983_v28 = vpop.eup %982 }
 0x2b5   : >> { %501 = vperm.xlu1 %972, %v983_v28  }
 0x330   : >> { %v502_v29 = vpop.permute.xlu1 %501 }
 0x331   : >> { %v504_v31 = vmul.f32 %v502_v29, %v490_v22  }
 0x333   : >> { %506 = vrot.lane.b32.xlu1 %v504_v31, %s1111_s28  ;;  %v1354_v0 = vmov %v504_v31  ;;  %v509_v33 = vmul.f32 (%p277_p11), %v504_v31, %v504_v31 }
 0x335   : > { %v511_v34 = vsel (%p277_p11), %vm284_vm2, %v509_v33, 0.0 }
 0x336   : > { %512 = vadd.xlane.f32.xlu0 (%p277_p11), %v511_v34 }
 0x3a2   : > { %279 = sbr.rel (!%p277_p11) target bundleno = 64 (0x40), region = 97 }
 0x3a5   : >> { %v507_v32 = vpop.permute.xlu1 %506  }
 0x3a6   : >> { %v1353_v1 = vmov %v507_v32  ;;  %893 = vmatmul.mubr.msk.f32.vlgmr.msra.gmra.mxu1 (%p277_p11), %vm356_vm4, %v507_v32  ;;  %v581_v2 = vmul.f32 (%p277_p11), %v507_v32, %v507_v32 }
 0x3a8   : > { %v583_v3 = vsel %vm356_vm4, %v581_v2, 0.0 }
 0x3a9   : > { %584 = vadd.xlane.f32.xlu0 %v583_v3 }
 0x3bf   : > { %v513_v7 = vpop.xlane.xlu0 %512 }
 0x3c0   : > { %v514_v8 = vmax.f32 %v513_v7, 1e-24 }
 0x3c2   : > { %984 = vrsqrt.f32 %v514_v8 }
 0x3cf   : > { %v985_v30 = vpop.eup %984 }
 0x3d0   : > { %v516_v36 = vmul.f32 %v985_v30, %v504_v31 }
 0x3d2   : > { %673 = vst.msk [vmem:[%s1234_s22] sm:$0xff] %vm284_vm2, %v516_v36  ;;  %v517_v4 = vpack.c.bf16 %v516_v36, %v516_v36 }
 0x3d4   : > { %887 = vmatmul.mubr.msk.bf16.vlgmr.msra.gmra.mxu0 %vm284_vm2, %v517_v4 }
 0x466   : > { %v659_v37 = vpop.f32.mrf.mxu1 }
 0x468   : > { %v894_v38 = vpop.f32.mrf.mxu1 }
 0x469   : > { %1005 = shalt.err (!%p1002_p4)
}
 0x46a   : > { %s1006_s13 = scalar_lea.hbm %s704_s6, 128  ;;  %s1010_s23 = scalar_lea.hbm %s1350_s4, 256 }
 0x46b   : > { %p1007_p7 = scmp.ne.s32.totalorder %s704_s6, %s1006_s13  ;;  %p1011_p10 = scmp.lt.s32.totalorder %s704_s6, %s1350_s4 }
 0x46c   : > { %p1012_p11 = scmp.lt.s32.totalorder %s1010_s23, %s1006_s13 }
 0x46d   : > { %p1008_p8 = pnand %p1007_p7, %p1179_p5 }
 0x46e   : > { %p1013_p12 = por %p1012_p11, %p1011_p10 }
 0x46f   : > { %p1009_p9 = pneg %p1008_p8 }
 0x471   : > { %p1014_p13 = pnand %p1013_p12, %p1009_p9 }
 0x473   : > { %1017 = shalt.err (!%p1014_p13)
}
 0x474   : > { %897 = dma.vmem_to_hbm [thread:$0]  (%p1179_p5), %s707_s7, 128, %s704_s6, %s680_s8   ;;  %v585_v53 = vpop.xlane.xlu0 %584  ;;  %v664_v54 = vmul.f32 2.0, %v659_v37 }
 0x475   : > { %v663_v55 = vadd.f32 %v585_v53, %v1222_v24  ;;  %s693_s5 = sshll.u32 %s1230_s20, 4  ;;  %s691_s8 = scalar_lea.hbm %s1349_s3, %s850_s29  ;;  %s694_s5 = int_to_ptr.vmem [resolvable:$true] %s693_s5 }
 0x476   : > { %s675_s9 = scalar_lea.sflag [#allocation3], %s1190_s27  ;;  %s1018_s10 = scalar_lea.vmem %s694_s5, 128 }
 0x477   : > { %v665_v56 = vsub.f32 %v663_v55, %v664_v54  ;;  %p1019_p0 = scmp.ne.s32.totalorder %s694_s5, %s1018_s10  ;;  %s1115_s11 = smov [#allocation2]  }
 0x478   : > { %s1022_s12 = sshll.u32 %s1115_s11, 4  ;;  %s1023_s12 = int_to_ptr.vmem [resolvable:$false] %s1022_s12 }
 0x479   : > { %v666_v57 = vmax.f32 %v665_v56, 0.0  ;;  %p1020_p1 = pnand %p1019_p0, %p1179_p5  ;;  %s1024_s13 = scalar_lea.vmem %s1023_s12, 256 }
 0x47a   : > { %p1025_p3 = scmp.lt.s32.totalorder %s694_s5, %s1023_s12  ;;  %p1026_p4 = scmp.lt.s32.totalorder %s1024_s13, %s1018_s10 }
 0x47b   : > { %v667_v60 = vsub.f32 0.0, %v666_v57  ;;  %p1021_p2 = pneg %p1020_p1 }
 0x47c   : > { %p1027_p7 = por %p1026_p4, %p1025_p3 }
 0x47d   : > { %v668_v63 = vmul.f32 0.00016925125, %v667_v60 }
 0x47e   : > { %p1028_p8 = pnand %p1027_p7, %p1021_p2 }
 0x47f   : > { %v669_v5 = vmul.f32 1.442695, %v668_v63 }
 0x494   : > { %v555_v39 = vpop.f32.mrf.mxu0 }
 0x495   : > { %v561_v40 = vmul.f32 30.30303, %v555_v39 }
 0x496   : > { %v888_v41 = vpop.f32.mrf.mxu0 }
 0x497   : > { %v562_v42 = vsel %vm247_vm0, %v561_v40, -inf }
 0x498   : > { %v563_v43 = vrot.slane %v562_v42, 4  ;;  %v558_v44 = vpop.f32.mrf.mxu0 }
 0x49a   : > { %v564_v45 = vmax.f32 %v562_v42, %v563_v43  ;;  %v889_v46 = vpop.f32.mrf.mxu0 }
 0x49c   : > { %v565_v47 = vrot.slane %v564_v45, 2 }
 0x49e   : > { %v566_v48 = vmax.f32 %v564_v45, %v565_v47 }
 0x4a0   : > { %v567_v49 = vrot.slane %v566_v48, 1 }
 0x4a2   : > { %v568_v50 = vmax.f32 %v566_v48, %v567_v49 }
 0x4a4   : > { %v569_v51 = vsub.f32 %v561_v40, %v568_v50 }
 0x4a6   : > { %v570_v52 = vmul.f32 1.442695, %v569_v51 }
 0x4a8   : > { %986 = vpow2.f32 %v570_v52 }
 0x4a9   : > { %988 = vpow2.f32 %v669_v5 }
 0x4b5   : > { %v987_v58 = vpop.eup %986 }
 0x4b6   : > { %v572_v59 = vsel %vm247_vm0, %v987_v58, 0.0  ;;  %v989_v24 = vpop.eup %988 }
 0x4b7   : > { %v573_v61 = vrot.slane %v572_v59, 4 }
 0x4b9   : > { %v574_v62 = vadd.f32 %v573_v61, %v572_v59 }
 0x4bb   : > { %v575_v0 = vrot.slane %v574_v62, 2 }
 0x4bd   : > { %v576_v1 = vadd.f32 %v575_v0, %v574_v62 }
 0x4bf   : > { %v577_v6 = vrot.slane %v576_v1, 1 }
 0x4c1   : > { %v578_v9 = vadd.f32 %v577_v6, %v576_v1 }
 0x4c3   : > { %990 = vrcp.f32 %v578_v9 }
 0x4d0   : > { %v991_v10 = vpop.eup %990 }
 0x4d1   : > { %v580_v11 = vmul.f32 %v991_v10, %v987_v58 }
 0x4d3   : > { %v671_v12 = vmul.f32 %v989_v24, %v580_v11 }
 0x4d5   : > { %672 = vst.msk [vmem:[%s1230_s20] sm:$0xff] %vm247_vm0, %v671_v12 }
 0x4d6   : > { %1031 = shalt.err (!%p1028_p8)
}
 0x4d7   : > { %s1032_s19 = scalar_lea.hbm %s691_s8, 128  ;;  %s1036_s29 = scalar_lea.hbm %s1349_s3, 256 }
 0x4d8   : > { %p1033_p9 = scmp.ne.s32.totalorder %s691_s8, %s1032_s19  ;;  %p1037_p12 = scmp.lt.s32.totalorder %s691_s8, %s1349_s3 }
 0x4d9   : > { %p1038_p13 = scmp.lt.s32.totalorder %s1036_s29, %s1032_s19 }
 0x4da   : > { %p1034_p10 = pnand %p1033_p9, %p1179_p5 }
 0x4db   : > { %p1039_p0 = por %p1038_p13, %p1037_p12 }
 0x4dc   : > { %p1035_p11 = pneg %p1034_p10 }
 0x4de   : > { %p1040_p1 = pnand %p1039_p0, %p1035_p11 }
 0x4e0   : > { %1043 = shalt.err (!%p1040_p1)
}
 0x4e1   : > { %896 = dma.vmem_to_hbm [thread:$0]  (%p1179_p5), %s694_s5, 128, %s691_s8, %s675_s9  }
 0x4e2 PF: > { %p907_p2 = scmp.ge.s32.totalorder %s1094_s18, 2  ;;  %s718_s23 = sand.u32 1, %s1082_s15  }
 0x4e3   : > { %s719_s28 = scalar_lea.sflag [#allocation3], %s718_s23 }
 0x4e4   : > { %p901_p3 = pnand %p907_p2, %p1183_p6 }
 0x4e6   : > { %p902_p4 = pneg %p901_p3 }
 0x4e8   : > { %1073 = dma.done.wait (%p902_p4), %s719_s28, 128  }
 0x4e9   : > { %1075 = vsyncadd (%p902_p4), %s719_s28, 4294967168  ;;  %s728_s30 = scalar_lea.sflag [#allocation5], %s718_s23 }
 0x4ea   : > { %1077 = dma.done.wait (%p902_p4), %s728_s30, 128  }
 0x4eb   : > { %1079 = vsyncadd (%p902_p4), %s728_s30, 4294967168  ;;  %p18_p5 = scmp.ge.s32.totalorder %s1166_s21, 4   ;;  %s1355_s15 = smov %s1086_s16 }
 0x4ec   : > { %s1356_s16 = smov %s1090_s17  ;;  %s1357_s17 = smov %s1177_s24 }
 0x4ed   : > { %s1358_s18 = smov %s1166_s21  ;;  %20 = sbr.rel (!%p18_p5) target bundleno = 5 (0x5), region = 108 }
 0x4f2   :  { %733 = vsyncpa [#allocation3], 1 }
 0x4f3   :  { %735 = vsyncpa [#allocation3 + $0x1], 1 }
 0x4f4   :  { %736 = vsyncpa [#allocation5], 1 }
 0x4f5   :  { %738 = vsyncpa [#allocation5 + $0x1], 1 }

</bundles_post_ra>
